<compile_context>
chip_gen: v7x
topology: tpu7x:2x2x1
jax: 0.10.0
libtpu: 0.0.40
codegen_flags: <defaults>
</compile_context>

<pallas_src>
import jax
import jax.numpy as jnp
from jax.experimental import pallas as pl
from jax.experimental.pallas import tpu as pltpu

_LANE = 128
_SUBLANE = 8


def _round_up(x, m):
    return (x + m - 1) // m * m


def _stable_sigmoid(z):
    # sigmoid(z) == 0.5 * (tanh(z / 2) + 1): single EUP transcendental,
    # no VALU divide, no inf intermediates.
    return 0.5 * (jnp.tanh(0.5 * z) + 1.0)


# ---------------------------------------------------------------------------
# Fused kernel factory: one batch tile handles every group + the head.
# ---------------------------------------------------------------------------
def _make_kernel(n, dims, h_pad, mxu_dtype):
    def kernel(*refs):
        x_refs = refs[0:n]                      # (tb, dim_g) f32, unpadded
        we_refs = refs[n:2 * n]                 # (dim_g, e_pad) bf16
        be_refs = refs[2 * n:3 * n]             # (1, e_pad)     f32
        wdh_refs = refs[3 * n:4 * n]            # (e_pad, d_pad_g + h_pad) bf16
        bd_refs = refs[4 * n:5 * n]             # (1, dim_g)     f32
        bhwo_ref = refs[5 * n]                  # (2, h_pad)     f32 (bh | wo)
        bo_ref = refs[5 * n + 1]                # (1,)           f32 in SMEM
        dec_refs = refs[5 * n + 2:6 * n + 2]    # (tb, dim_g)    f32 outputs
        y_ref = refs[6 * n + 2]                 # (tb, 1)        f32 output

        tb = x_refs[0].shape[0]
        hid = jnp.zeros((tb, h_pad), jnp.float32)
        for g in range(n):                      # static unroll, n is tiny
            dim = dims[g]
            d_pad_g = wdh_refs[g].shape[1] - h_pad
            x = x_refs[g][...].astype(mxu_dtype)
            # encode: tanh(x @ We + be)   (K = dim_g, padded internally)
            enc = jnp.tanh(
                jnp.dot(x, we_refs[g][...],
                        preferred_element_type=jnp.float32)
                + be_refs[g][...])                              # (tb, e_pad)
            # fused decode + hidden matmul: N = d_pad_g + h_pad (256-wide MXU)
            out = jnp.dot(enc.astype(mxu_dtype), wdh_refs[g][...],
                          preferred_element_type=jnp.float32)
            # decode head -> compact, unpadded store
            dec_refs[g][...] = _stable_sigmoid(
                out[:, :dim] + bd_refs[g][...]).astype(dec_refs[g].dtype)
            # concat(encoded) @ Wh  ==  sum_g enc_g @ Wh_g (concat fused away)
            hid = hid + out[:, d_pad_g:]

        bhwo = bhwo_ref[...]                                    # (2, h_pad)
        h = jnp.maximum(hid + bhwo[0:1, :], 0.0)                # relu
        # H -> 1 projection: VPU multiply + XLU lane reduction (no N=1 MXU).
        y = jnp.sum(h * bhwo[1:2, :], axis=-1, keepdims=True) + bo_ref[0]
        y_ref[...] = y.astype(y_ref.dtype)                      # (tb, 1)

    return kernel


# ---------------------------------------------------------------------------
# Parameters (raw, torch-like) and packing to the kernel layout.
# ---------------------------------------------------------------------------
def init_hyper_embedding(key, input_dims, embedding_size, H):
    """Raw (unpadded) f32 parameters; weights stored as (in, out) so x @ W + b."""
    params = {"enc": [], "dec": []}
    for dim in input_dims:
        key, k1, k2, k3, k4 = jax.random.split(key, 5)
        params["enc"].append(
            (0.1 * jax.random.normal(k1, (dim, embedding_size), jnp.float32),
             0.1 * jax.random.normal(k2, (1, embedding_size), jnp.float32)))
        params["dec"].append(
            (0.1 * jax.random.normal(k3, (embedding_size, dim), jnp.float32),
             0.1 * jax.random.normal(k4, (1, dim), jnp.float32)))
    key, k1, k2, k3, k4 = jax.random.split(key, 5)
    n = len(input_dims)
    params["hidden"] = (
        0.1 * jax.random.normal(k1, (n * embedding_size, H), jnp.float32),
        0.1 * jax.random.normal(k2, (1, H), jnp.float32))
    params["out"] = (
        0.1 * jax.random.normal(k3, (H, 1), jnp.float32),
        0.1 * jax.random.normal(k4, (1, 1), jnp.float32))
    return params


def pack_params(params, input_dims, embedding_size, H,
                weight_dtype=jnp.bfloat16):
    """Per-group weights, [Wd|Wh] fused along N, MXU operands in bf16.

    Only the matmul N dims (E, H, per-group D) are zero-padded to 128 lanes;
    x inputs, decoded outputs and bd stay fully unpadded.
    """
    n = len(input_dims)
    e_pad = _round_up(embedding_size, _LANE)
    h_pad = _round_up(H, _LANE)

    w_h, b_h = params["hidden"]                 # (n*E, H), (1, H)
    w_h = w_h.reshape(n, embedding_size, H)
    w_o, b_o = params["out"]                    # (H, 1), (1, 1)

    we_l, be_l, wdh_l, bd_l, d_pads = [], [], [], [], []
    for g, dim in enumerate(input_dims):
        w_e, b_e = params["enc"][g]             # (dim, E), (1, E)
        w_d, b_d = params["dec"][g]             # (E, dim), (1, dim)
        d_pad_g = _round_up(dim, _LANE)
        we = jnp.zeros((dim, e_pad), jnp.float32).at[:, :embedding_size].set(w_e)
        be = jnp.zeros((1, e_pad), jnp.float32).at[:, :embedding_size].set(b_e)
        # fused [Wd | Wh] along N: one 256-wide matmul per group on v6e/v7x.
        wdh = jnp.zeros((e_pad, d_pad_g + h_pad), jnp.float32)
        wdh = wdh.at[:embedding_size, :dim].set(w_d)
        wdh = wdh.at[:embedding_size, d_pad_g:d_pad_g + H].set(w_h[g])
        we_l.append(we.astype(weight_dtype))
        be_l.append(be)
        wdh_l.append(wdh.astype(weight_dtype))
        bd_l.append(b_d.astype(jnp.float32))    # (1, dim), unpadded
        d_pads.append(d_pad_g)

    bhwo = jnp.zeros((2, h_pad), jnp.float32)
    bhwo = bhwo.at[0, :H].set(b_h[0])           # row 0: hidden bias
    bhwo = bhwo.at[1, :H].set(w_o[:, 0])        # row 1: output weight row
    bo = b_o.reshape((1,)).astype(jnp.float32)  # SMEM scalar

    return dict(we=we_l, be=be_l, wdh=wdh_l, bd=bd_l, bhwo=bhwo, bo=bo,
                dims=tuple(int(d) for d in input_dims),
                d_pads=tuple(d_pads), e=embedding_size, h=H,
                e_pad=e_pad, h_pad=h_pad, weight_dtype=weight_dtype)


# ---------------------------------------------------------------------------
# Generation-aware VMEM budgeting and batch-tile selection.
# ---------------------------------------------------------------------------
def _vmem_capacity_bytes():
    try:
        info = pltpu.get_tpu_info()
        for attr in ("vmem_capacity_bytes", "vmem_size_bytes", "vmem_bytes"):
            v = getattr(info, attr, None)
            if v:
                return int(v)
    except Exception:
        pass
    return 64 * 1024 * 1024      # conservative fallback (v7x: 64 MiB / TC)


def _vmem_block_bytes(shape, dtype):
    """Physical VMEM footprint of one block (last dim -> 128 lanes,
    second-last -> 8*packing sublanes)."""
    shape = tuple(shape)
    if len(shape) == 1:
        shape = (1,) + shape
    *lead, s, l = shape
    itemsize = jnp.dtype(dtype).itemsize
    packing = max(1, 4 // itemsize)
    phys = 1
    for d in lead:
        phys *= d
    phys *= _round_up(s, _SUBLANE * packing) * _round_up(l, _LANE)
    return phys * itemsize


def _pick_batch_tile(b, row_bytes, fixed_bytes, budget, min_steps=4,
                     tb_max=1024):
    b_pad8 = _round_up(b, _SUBLANE)
    tb = min(tb_max, b_pad8)
    # Guarantee >= min_steps grid steps (megacore on v7x, pipeline overlap
    # everywhere) whenever the batch is big enough to allow it.
    if b_pad8 >= min_steps * _SUBLANE:
        tb = min(tb, max(_SUBLANE, (b_pad8 // min_steps) // _SUBLANE * _SUBLANE))
    tb = max(_SUBLANE, (tb // _SUBLANE) * _SUBLANE)
    # Shrink until the double-buffered streaming blocks fit the budget.
    while tb > _SUBLANE and fixed_bytes + 2 * tb * row_bytes > budget:
        tb = max(_SUBLANE, (tb // 2) // _SUBLANE * _SUBLANE)
    return tb


# ---------------------------------------------------------------------------
# Forward
# ---------------------------------------------------------------------------
def hyper_embedding_forward(packed, xs):
    """xs: list of (B, input_dims[i]) float32 arrays.
    Returns (y_pred (B, 1), decoded: list of (B, input_dims[i]))."""
    dims = packed["dims"]
    n = len(dims)
    b = xs[0].shape[0]
    e_pad, h_pad = packed["e_pad"], packed["h_pad"]
    d_pads = packed["d_pads"]

    # ---- generation-aware VMEM sizing (v7x 64 MiB vs v5e/v6e 128 MiB) ----
    cap = _vmem_capacity_bytes()
    budget = min(int(cap * 0.70), 96 * 1024 * 1024)
    vmem_limit = min(int(cap * 0.875), 112 * 1024 * 1024)

    # Resident (weight/bias) VMEM.  NOTE: constant-index blocks are still
    # double-buffered by default; pl.Buffered(1) on these specs would halve
    # this once weights get large.
    fixed = sum(_vmem_block_bytes(w.shape, w.dtype)
                for w in packed["we"] + packed["wdh"]
                + packed["be"] + packed["bd"])
    fixed += _vmem_block_bytes(packed["bhwo"].shape, jnp.float32)
    fixed *= 2
    # Streaming VMEM per batch row: x_g, dec_g and y blocks each occupy a full
    # 128-lane physical row in VMEM even though their HBM traffic is unpadded.
    row = (2 * n + 1) * _LANE * 4
    # In-kernel f32 temporaries per row (enc, fused out, hid, h).
    row += (e_pad + (max(d_pads) + h_pad) + 2 * h_pad) * 4

    tb = _pick_batch_tile(b, row, fixed, budget)
    b_pad = _round_up(b, tb)
    grid = (b_pad // tb,)

    # Pad only the batch dim (rows beyond b are sliced off below).
    xs_p = []
    for x in xs:
        x = x.astype(jnp.float32)
        if b_pad != b:
            x = jnp.pad(x, ((0, b_pad - b), (0, 0)))
        xs_p.append(x)

    # ---- cost estimate ----
    flops = 2 * b_pad * h_pad
    transcendentals = 0
    for g, d in enumerate(dims):
        flops += 2 * b_pad * (d * e_pad + e_pad * (d_pads[g] + h_pad))
        transcendentals += b_pad * (e_pad + d)
    bytes_accessed = 4 * b_pad * (2 * sum(dims) + 1)           # x, dec, y
    bytes_accessed += sum(int(w.size) * w.dtype.itemsize
                          for w in packed["we"] + packed["be"]
                          + packed["wdh"] + packed["bd"])
    bytes_accessed += int(packed["bhwo"].size) * 4 + 4

    kernel = _make_kernel(n, dims, h_pad, packed["weight_dtype"])

    in_specs = (
        [pl.BlockSpec((tb, d), lambda i: (i, 0)) for d in dims]        # x_g
        + [pl.BlockSpec(w.shape, lambda i: (0, 0)) for w in packed["we"]]
        + [pl.BlockSpec(w.shape, lambda i: (0, 0)) for w in packed["be"]]
        + [pl.BlockSpec(w.shape, lambda i: (0, 0)) for w in packed["wdh"]]
        + [pl.BlockSpec(w.shape, lambda i: (0, 0)) for w in packed["bd"]]
        + [pl.BlockSpec(packed["bhwo"].shape, lambda i: (0, 0)),       # bh|wo
           pl.BlockSpec(memory_space=pltpu.MemorySpace.SMEM)])         # bo

    out_shape = tuple(
        [jax.ShapeDtypeStruct((b_pad, d), jnp.float32) for d in dims]  # dec_g
        + [jax.ShapeDtypeStruct((b_pad, 1), jnp.float32)])             # y
    out_specs = tuple(
        [pl.BlockSpec((tb, d), lambda i: (i, 0)) for d in dims]
        + [pl.BlockSpec((tb, 1), lambda i: (i, 0))])

    outs = pl.pallas_call(
        kernel,
        out_shape=out_shape,
        grid=grid,
        in_specs=in_specs,
        out_specs=out_specs,
        compiler_params=pltpu.CompilerParams(
            dimension_semantics=("parallel",),
            vmem_limit_bytes=int(vmem_limit)),
        cost_estimate=pl.CostEstimate(flops=int(flops),
                                      transcendentals=int(transcendentals),
                                      bytes_accessed=int(bytes_accessed)),
    )(*xs_p, *packed["we"], *packed["be"], *packed["wdh"], *packed["bd"],
      packed["bhwo"], packed["bo"])

    decoded = [outs[g][:b] for g in range(n)]
    y_pred = outs[n][:b]
    return y_pred, decoded


# ---------------------------------------------------------------------------
# Pure-JAX f32 reference for the correctness check
# ---------------------------------------------------------------------------
def _reference_fwd(params, xs):
    encoded = [jnp.tanh(x @ we + be)
               for x, (we, be) in zip(xs, params["enc"])]
    decoded = [jax.nn.sigmoid(enc @ wd + bd)
               for enc, (wd, bd) in zip(encoded, params["dec"])]
    merged = jnp.concatenate(encoded, axis=1)
    wh, bh = params["hidden"]
    wo, bo = params["out"]
    h = jnp.maximum(merged @ wh + bh, 0.0)
    return h @ wo + bo, decoded


# ---------------------------------------------------------------------------
if __name__ == "__main__":
    input_dims = [16, 8, 12]
    embedding_size = 32
    H = 32
    B = 2

    key = jax.random.PRNGKey(0)
    kp, kx = jax.random.split(key)
    params = init_hyper_embedding(kp, input_dims, embedding_size, H)
    packed = pack_params(params, input_dims, embedding_size, H)

    xs = []
    for dim in input_dims:
        kx, sub = jax.random.split(kx)
        xs.append(jax.random.normal(sub, (B, dim), jnp.float32))

    y_pred, decoded = hyper_embedding_forward(packed, xs)
    y_pred = jax.block_until_ready(y_pred)
    decoded = [jax.block_until_ready(d) for d in decoded]

    y_ref, dec_ref = _reference_fwd(params, xs)
    assert y_pred.shape == (B, 1)
    assert all(d.shape == (B, dim) for d, dim in zip(decoded, input_dims))
    # MXU operands are bf16 (per perf review) -> compare at bf16-level tolerance.
    assert jnp.allclose(y_pred, y_ref, atol=2e-2, rtol=2e-2), "y_pred mismatch"
    for d, dr in zip(decoded, dec_ref):
        assert jnp.allclose(d, dr, atol=2e-2, rtol=2e-2), "decoded mismatch"

    print("KERNEL_OK")
</pallas_src>

<mosaic_0001>
module attributes {stable_mosaic.version = 11 : i64} {
  func.func @kernel(%arg0: i32, %arg1: memref<8x16xf32, #tpu.memory_space<vmem>>, %arg2: memref<8x8xf32, #tpu.memory_space<vmem>>, %arg3: memref<8x12xf32, #tpu.memory_space<vmem>>, %arg4: memref<16x128xbf16, #tpu.memory_space<vmem>>, %arg5: memref<8x128xbf16, #tpu.memory_space<vmem>>, %arg6: memref<12x128xbf16, #tpu.memory_space<vmem>>, %arg7: memref<1x128xf32, #tpu.memory_space<vmem>>, %arg8: memref<1x128xf32, #tpu.memory_space<vmem>>, %arg9: memref<1x128xf32, #tpu.memory_space<vmem>>, %arg10: memref<128x256xbf16, #tpu.memory_space<vmem>>, %arg11: memref<128x256xbf16, #tpu.memory_space<vmem>>, %arg12: memref<128x256xbf16, #tpu.memory_space<vmem>>, %arg13: memref<1x16xf32, #tpu.memory_space<vmem>>, %arg14: memref<1x8xf32, #tpu.memory_space<vmem>>, %arg15: memref<1x12xf32, #tpu.memory_space<vmem>>, %arg16: memref<2x128xf32, #tpu.memory_space<vmem>>, %arg17: memref<1xf32, #tpu.memory_space<smem>>, %arg18: memref<8x16xf32, #tpu.memory_space<vmem>>, %arg19: memref<8x8xf32, #tpu.memory_space<vmem>>, %arg20: memref<8x12xf32, #tpu.memory_space<vmem>>, %arg21: memref<8x1xf32, #tpu.memory_space<vmem>>) attributes {dimension_semantics = [#tpu.dimension_semantics<parallel>], iteration_bounds = array<i64: 1>, scalar_prefetch = 0 : i64, scratch_operands = 0 : i64, tpu.core_type = #tpu.core_type<tc>, window_params = [{transform_indices = @transform_0, window_bounds = array<i64: 8, 16>}, {transform_indices = @transform_1, window_bounds = array<i64: 8, 8>}, {transform_indices = @transform_2, window_bounds = array<i64: 8, 12>}, {pipeline_mode = #tpu.pipeline_mode<synchronous>, transform_indices = @transform_3, window_bounds = array<i64: 16, 128>}, {pipeline_mode = #tpu.pipeline_mode<synchronous>, transform_indices = @transform_4, window_bounds = array<i64: 8, 128>}, {pipeline_mode = #tpu.pipeline_mode<synchronous>, transform_indices = @transform_5, window_bounds = array<i64: 12, 128>}, {pipeline_mode = #tpu.pipeline_mode<synchronous>, transform_indices = @transform_6, window_bounds = array<i64: 1, 128>}, {pipeline_mode = #tpu.pipeline_mode<synchronous>, transform_indices = @transform_7, window_bounds = array<i64: 1, 128>}, {pipeline_mode = #tpu.pipeline_mode<synchronous>, transform_indices = @transform_8, window_bounds = array<i64: 1, 128>}, {pipeline_mode = #tpu.pipeline_mode<synchronous>, transform_indices = @transform_9, window_bounds = array<i64: 128, 256>}, {pipeline_mode = #tpu.pipeline_mode<synchronous>, transform_indices = @transform_10, window_bounds = array<i64: 128, 256>}, {pipeline_mode = #tpu.pipeline_mode<synchronous>, transform_indices = @transform_11, window_bounds = array<i64: 128, 256>}, {pipeline_mode = #tpu.pipeline_mode<synchronous>, transform_indices = @transform_12, window_bounds = array<i64: 1, 16>}, {pipeline_mode = #tpu.pipeline_mode<synchronous>, transform_indices = @transform_13, window_bounds = array<i64: 1, 8>}, {pipeline_mode = #tpu.pipeline_mode<synchronous>, transform_indices = @transform_14, window_bounds = array<i64: 1, 12>}, {pipeline_mode = #tpu.pipeline_mode<synchronous>, transform_indices = @transform_15, window_bounds = array<i64: 2, 128>}, {transform_indices = @transform_16, window_bounds = array<i64: 1>}, {transform_indices = @transform_17, window_bounds = array<i64: 8, 16>}, {transform_indices = @transform_18, window_bounds = array<i64: 8, 8>}, {transform_indices = @transform_19, window_bounds = array<i64: 8, 12>}, {transform_indices = @transform_20, window_bounds = array<i64: 8, 1>}]} {
    %cst = arith.constant 0.000000e+00 : f32
    %0 = vector.broadcast %cst : f32 to vector<8x128xf32>
    %c0 = arith.constant 0 : index
    %c0_0 = arith.constant 0 : index
    %1 = vector.load %arg1[%c0, %c0_0] : memref<8x16xf32, #tpu.memory_space<vmem>>, vector<8x16xf32>
    %2 = arith.truncf %1 : vector<8x16xf32> to vector<8x16xbf16>
    %c0_1 = arith.constant 0 : index
    %c0_2 = arith.constant 0 : index
    %3 = vector.load %arg4[%c0_1, %c0_2] : memref<16x128xbf16, #tpu.memory_space<vmem>>, vector<16x128xbf16>
    %cst_3 = arith.constant dense<0.000000e+00> : vector<8x128xf32>
    %4 = tpu.matmul %2, %3, %cst_3 {dimension_numbers = #tpu.dot_dimension_numbers<[1], [0], [0], [1], [0, 0, 1, 1], [], []>} : vector<8x16xbf16>, vector<16x128xbf16>, vector<8x128xf32> -> vector<8x128xf32>
    %c0_4 = arith.constant 0 : index
    %c0_5 = arith.constant 0 : index
    %5 = vector.load %arg7[%c0_4, %c0_5] : memref<1x128xf32, #tpu.memory_space<vmem>>, vector<1x128xf32>
    %6 = vector.broadcast %5 : vector<1x128xf32> to vector<8x128xf32>
    %7 = arith.addf %4, %6 : vector<8x128xf32>
    %8 = math.tanh %7 : vector<8x128xf32>
    %9 = arith.truncf %8 : vector<8x128xf32> to vector<8x128xbf16>
    %c0_6 = arith.constant 0 : index
    %c0_7 = arith.constant 0 : index
    %10 = vector.load %arg10[%c0_6, %c0_7] : memref<128x256xbf16, #tpu.memory_space<vmem>>, vector<128x256xbf16>
    %cst_8 = arith.constant dense<0.000000e+00> : vector<8x256xf32>
    %11 = tpu.matmul %9, %10, %cst_8 {dimension_numbers = #tpu.dot_dimension_numbers<[1], [0], [0], [1], [0, 0, 1, 1], [], []>} : vector<8x128xbf16>, vector<128x256xbf16>, vector<8x256xf32> -> vector<8x256xf32>
    %12 = vector.extract_strided_slice %11 {offsets = [0, 0], sizes = [8, 16], strides = [1, 1]} : vector<8x256xf32> to vector<8x16xf32>
    %c0_9 = arith.constant 0 : index
    %c0_10 = arith.constant 0 : index
    %13 = vector.load %arg13[%c0_9, %c0_10] : memref<1x16xf32, #tpu.memory_space<vmem>>, vector<1x16xf32>
    %14 = vector.broadcast %13 : vector<1x16xf32> to vector<8x16xf32>
    %15 = arith.addf %12, %14 : vector<8x16xf32>
    %cst_11 = arith.constant 5.000000e-01 : f32
    %16 = vector.broadcast %cst_11 : f32 to vector<8x16xf32>
    %17 = arith.mulf %16, %15 : vector<8x16xf32>
    %18 = math.tanh %17 : vector<8x16xf32>
    %cst_12 = arith.constant 1.000000e+00 : f32
    %19 = vector.broadcast %cst_12 : f32 to vector<8x16xf32>
    %20 = arith.addf %18, %19 : vector<8x16xf32>
    %cst_13 = arith.constant 5.000000e-01 : f32
    %21 = vector.broadcast %cst_13 : f32 to vector<8x16xf32>
    %22 = arith.mulf %21, %20 : vector<8x16xf32>
    %c0_14 = arith.constant 0 : index
    %c0_15 = arith.constant 0 : index
    %23 = vector.load %arg18[%c0_14, %c0_15] : memref<8x16xf32, #tpu.memory_space<vmem>>, vector<8x16xf32>
    tpu.vector_store %arg18[%c0_14, %c0_15], %22 {strides = array<i32>} : memref<8x16xf32, #tpu.memory_space<vmem>>, vector<8x16xf32>,
    %24 = vector.extract_strided_slice %11 {offsets = [0, 128], sizes = [8, 128], strides = [1, 1]} : vector<8x256xf32> to vector<8x128xf32>
    %25 = arith.addf %0, %24 : vector<8x128xf32>
    %c0_16 = arith.constant 0 : index
    %c0_17 = arith.constant 0 : index
    %26 = vector.load %arg2[%c0_16, %c0_17] : memref<8x8xf32, #tpu.memory_space<vmem>>, vector<8x8xf32>
    %27 = arith.truncf %26 : vector<8x8xf32> to vector<8x8xbf16>
    %c0_18 = arith.constant 0 : index
    %c0_19 = arith.constant 0 : index
    %28 = vector.load %arg5[%c0_18, %c0_19] : memref<8x128xbf16, #tpu.memory_space<vmem>>, vector<8x128xbf16>
    %cst_20 = arith.constant dense<0.000000e+00> : vector<8x128xf32>
    %29 = tpu.matmul %27, %28, %cst_20 {dimension_numbers = #tpu.dot_dimension_numbers<[1], [0], [0], [1], [0, 0, 1, 1], [], []>} : vector<8x8xbf16>, vector<8x128xbf16>, vector<8x128xf32> -> vector<8x128xf32>
    %c0_21 = arith.constant 0 : index
    %c0_22 = arith.constant 0 : index
    %30 = vector.load %arg8[%c0_21, %c0_22] : memref<1x128xf32, #tpu.memory_space<vmem>>, vector<1x128xf32>
    %31 = vector.broadcast %30 : vector<1x128xf32> to vector<8x128xf32>
    %32 = arith.addf %29, %31 : vector<8x128xf32>
    %33 = math.tanh %32 : vector<8x128xf32>
    %34 = arith.truncf %33 : vector<8x128xf32> to vector<8x128xbf16>
    %c0_23 = arith.constant 0 : index
    %c0_24 = arith.constant 0 : index
    %35 = vector.load %arg11[%c0_23, %c0_24] : memref<128x256xbf16, #tpu.memory_space<vmem>>, vector<128x256xbf16>
    %cst_25 = arith.constant dense<0.000000e+00> : vector<8x256xf32>
    %36 = tpu.matmul %34, %35, %cst_25 {dimension_numbers = #tpu.dot_dimension_numbers<[1], [0], [0], [1], [0, 0, 1, 1], [], []>} : vector<8x128xbf16>, vector<128x256xbf16>, vector<8x256xf32> -> vector<8x256xf32>
    %37 = vector.extract_strided_slice %36 {offsets = [0, 0], sizes = [8, 8], strides = [1, 1]} : vector<8x256xf32> to vector<8x8xf32>
    %c0_26 = arith.constant 0 : index
    %c0_27 = arith.constant 0 : index
    %38 = vector.load %arg14[%c0_26, %c0_27] : memref<1x8xf32, #tpu.memory_space<vmem>>, vector<1x8xf32>
    %39 = vector.broadcast %38 : vector<1x8xf32> to vector<8x8xf32>
    %40 = arith.addf %37, %39 : vector<8x8xf32>
    %cst_28 = arith.constant 5.000000e-01 : f32
    %41 = vector.broadcast %cst_28 : f32 to vector<8x8xf32>
    %42 = arith.mulf %41, %40 : vector<8x8xf32>
    %43 = math.tanh %42 : vector<8x8xf32>
    %cst_29 = arith.constant 1.000000e+00 : f32
    %44 = vector.broadcast %cst_29 : f32 to vector<8x8xf32>
    %45 = arith.addf %43, %44 : vector<8x8xf32>
    %cst_30 = arith.constant 5.000000e-01 : f32
    %46 = vector.broadcast %cst_30 : f32 to vector<8x8xf32>
    %47 = arith.mulf %46, %45 : vector<8x8xf32>
    %c0_31 = arith.constant 0 : index
    %c0_32 = arith.constant 0 : index
    %48 = vector.load %arg19[%c0_31, %c0_32] : memref<8x8xf32, #tpu.memory_space<vmem>>, vector<8x8xf32>
    tpu.vector_store %arg19[%c0_31, %c0_32], %47 {strides = array<i32>} : memref<8x8xf32, #tpu.memory_space<vmem>>, vector<8x8xf32>,
    %49 = vector.extract_strided_slice %36 {offsets = [0, 128], sizes = [8, 128], strides = [1, 1]} : vector<8x256xf32> to vector<8x128xf32>
    %50 = arith.addf %25, %49 : vector<8x128xf32>
    %c0_33 = arith.constant 0 : index
    %c0_34 = arith.constant 0 : index
    %51 = vector.load %arg3[%c0_33, %c0_34] : memref<8x12xf32, #tpu.memory_space<vmem>>, vector<8x12xf32>
    %52 = arith.truncf %51 : vector<8x12xf32> to vector<8x12xbf16>
    %c0_35 = arith.constant 0 : index
    %c0_36 = arith.constant 0 : index
    %53 = vector.load %arg6[%c0_35, %c0_36] : memref<12x128xbf16, #tpu.memory_space<vmem>>, vector<12x128xbf16>
    %cst_37 = arith.constant dense<0.000000e+00> : vector<8x128xf32>
    %54 = tpu.matmul %52, %53, %cst_37 {dimension_numbers = #tpu.dot_dimension_numbers<[1], [0], [0], [1], [0, 0, 1, 1], [], []>} : vector<8x12xbf16>, vector<12x128xbf16>, vector<8x128xf32> -> vector<8x128xf32>
    %c0_38 = arith.constant 0 : index
    %c0_39 = arith.constant 0 : index
    %55 = vector.load %arg9[%c0_38, %c0_39] : memref<1x128xf32, #tpu.memory_space<vmem>>, vector<1x128xf32>
    %56 = vector.broadcast %55 : vector<1x128xf32> to vector<8x128xf32>
    %57 = arith.addf %54, %56 : vector<8x128xf32>
    %58 = math.tanh %57 : vector<8x128xf32>
    %59 = arith.truncf %58 : vector<8x128xf32> to vector<8x128xbf16>
    %c0_40 = arith.constant 0 : index
    %c0_41 = arith.constant 0 : index
    %60 = vector.load %arg12[%c0_40, %c0_41] : memref<128x256xbf16, #tpu.memory_space<vmem>>, vector<128x256xbf16>
    %cst_42 = arith.constant dense<0.000000e+00> : vector<8x256xf32>
    %61 = tpu.matmul %59, %60, %cst_42 {dimension_numbers = #tpu.dot_dimension_numbers<[1], [0], [0], [1], [0, 0, 1, 1], [], []>} : vector<8x128xbf16>, vector<128x256xbf16>, vector<8x256xf32> -> vector<8x256xf32>
    %62 = vector.extract_strided_slice %61 {offsets = [0, 0], sizes = [8, 12], strides = [1, 1]} : vector<8x256xf32> to vector<8x12xf32>
    %c0_43 = arith.constant 0 : index
    %c0_44 = arith.constant 0 : index
    %63 = vector.load %arg15[%c0_43, %c0_44] : memref<1x12xf32, #tpu.memory_space<vmem>>, vector<1x12xf32>
    %64 = vector.broadcast %63 : vector<1x12xf32> to vector<8x12xf32>
    %65 = arith.addf %62, %64 : vector<8x12xf32>
    %cst_45 = arith.constant 5.000000e-01 : f32
    %66 = vector.broadcast %cst_45 : f32 to vector<8x12xf32>
    %67 = arith.mulf %66, %65 : vector<8x12xf32>
    %68 = math.tanh %67 : vector<8x12xf32>
    %cst_46 = arith.constant 1.000000e+00 : f32
    %69 = vector.broadcast %cst_46 : f32 to vector<8x12xf32>
    %70 = arith.addf %68, %69 : vector<8x12xf32>
    %cst_47 = arith.constant 5.000000e-01 : f32
    %71 = vector.broadcast %cst_47 : f32 to vector<8x12xf32>
    %72 = arith.mulf %71, %70 : vector<8x12xf32>
    %c0_48 = arith.constant 0 : index
    %c0_49 = arith.constant 0 : index
    %73 = vector.load %arg20[%c0_48, %c0_49] : memref<8x12xf32, #tpu.memory_space<vmem>>, vector<8x12xf32>
    tpu.vector_store %arg20[%c0_48, %c0_49], %72 {strides = array<i32>} : memref<8x12xf32, #tpu.memory_space<vmem>>, vector<8x12xf32>,
    %74 = vector.extract_strided_slice %61 {offsets = [0, 128], sizes = [8, 128], strides = [1, 1]} : vector<8x256xf32> to vector<8x128xf32>
    %75 = arith.addf %50, %74 : vector<8x128xf32>
    %c0_50 = arith.constant 0 : index
    %c0_51 = arith.constant 0 : index
    %76 = vector.load %arg16[%c0_50, %c0_51] : memref<2x128xf32, #tpu.memory_space<vmem>>, vector<2x128xf32>
    %77 = vector.extract_strided_slice %76 {offsets = [0, 0], sizes = [1, 128], strides = [1, 1]} : vector<2x128xf32> to vector<1x128xf32>
    %78 = vector.broadcast %77 : vector<1x128xf32> to vector<8x128xf32>
    %79 = arith.addf %75, %78 : vector<8x128xf32>
    %cst_52 = arith.constant 0.000000e+00 : f32
    %80 = vector.broadcast %cst_52 : f32 to vector<8x128xf32>
    %81 = arith.maximumf %79, %80 : vector<8x128xf32>
    %82 = vector.extract_strided_slice %76 {offsets = [1, 0], sizes = [1, 128], strides = [1, 1]} : vector<2x128xf32> to vector<1x128xf32>
    %83 = vector.broadcast %82 : vector<1x128xf32> to vector<8x128xf32>
    %84 = arith.mulf %81, %83 : vector<8x128xf32>
    %cst_53 = arith.constant dense<0.000000e+00> : vector<8xf32>
    %85 = vector.multi_reduction <add>, %84, %cst_53 [1] : vector<8x128xf32> to vector<8xf32>
    %86 = vector.shape_cast %85 : vector<8xf32> to vector<8x1xf32>
    %c0_54 = arith.constant 0 : index
    %87 = memref.load %arg17[%c0_54] : memref<1xf32, #tpu.memory_space<smem>>
    %88 = vector.broadcast %87 : f32 to vector<8x1xf32>
    %89 = arith.addf %86, %88 : vector<8x1xf32>
    %c0_55 = arith.constant 0 : index
    %c0_56 = arith.constant 0 : index
    %90 = vector.load %arg21[%c0_55, %c0_56] : memref<8x1xf32, #tpu.memory_space<vmem>>, vector<8x1xf32>
    tpu.vector_store %arg21[%c0_55, %c0_56], %89 {strides = array<i32>} : memref<8x1xf32, #tpu.memory_space<vmem>>, vector<8x1xf32>,
    return
  }
  func.func @transform_0(%arg0: i32) -> (i32, i32) {
    %c0_i32 = arith.constant 0 : i32
    %c0_i32_0 = arith.constant 0 : i32
    return %arg0, %c0_i32 : i32, i32
  }
  func.func @transform_1(%arg0: i32) -> (i32, i32) {
    %c0_i32 = arith.constant 0 : i32
    %c0_i32_0 = arith.constant 0 : i32
    return %arg0, %c0_i32 : i32, i32
  }
  func.func @transform_2(%arg0: i32) -> (i32, i32) {
    %c0_i32 = arith.constant 0 : i32
    %c0_i32_0 = arith.constant 0 : i32
    return %arg0, %c0_i32 : i32, i32
  }
  func.func @transform_3(%arg0: i32) -> (i32, i32) {
    %c0_i32 = arith.constant 0 : i32
    %c0_i32_0 = arith.constant 0 : i32
    %c0_i32_1 = arith.constant 0 : i32
    return %c0_i32, %c0_i32_0 : i32, i32
  }
  func.func @transform_4(%arg0: i32) -> (i32, i32) {
    %c0_i32 = arith.constant 0 : i32
    %c0_i32_0 = arith.constant 0 : i32
    %c0_i32_1 = arith.constant 0 : i32
    return %c0_i32, %c0_i32_0 : i32, i32
  }
  func.func @transform_5(%arg0: i32) -> (i32, i32) {
    %c0_i32 = arith.constant 0 : i32
    %c0_i32_0 = arith.constant 0 : i32
    %c0_i32_1 = arith.constant 0 : i32
    return %c0_i32, %c0_i32_0 : i32, i32
  }
  func.func @transform_6(%arg0: i32) -> (i32, i32) {
    %c0_i32 = arith.constant 0 : i32
    %c0_i32_0 = arith.constant 0 : i32
    %c0_i32_1 = arith.constant 0 : i32
    return %c0_i32, %c0_i32_0 : i32, i32
  }
  func.func @transform_7(%arg0: i32) -> (i32, i32) {
    %c0_i32 = arith.constant 0 : i32
    %c0_i32_0 = arith.constant 0 : i32
    %c0_i32_1 = arith.constant 0 : i32
    return %c0_i32, %c0_i32_0 : i32, i32
  }
  func.func @transform_8(%arg0: i32) -> (i32, i32) {
    %c0_i32 = arith.constant 0 : i32
    %c0_i32_0 = arith.constant 0 : i32
    %c0_i32_1 = arith.constant 0 : i32
    return %c0_i32, %c0_i32_0 : i32, i32
  }
  func.func @transform_9(%arg0: i32) -> (i32, i32) {
    %c0_i32 = arith.constant 0 : i32
    %c0_i32_0 = arith.constant 0 : i32
    %c0_i32_1 = arith.constant 0 : i32
    return %c0_i32, %c0_i32_0 : i32, i32
  }
  func.func @transform_10(%arg0: i32) -> (i32, i32) {
    %c0_i32 = arith.constant 0 : i32
    %c0_i32_0 = arith.constant 0 : i32
    %c0_i32_1 = arith.constant 0 : i32
    return %c0_i32, %c0_i32_0 : i32, i32
  }
  func.func @transform_11(%arg0: i32) -> (i32, i32) {
    %c0_i32 = arith.constant 0 : i32
    %c0_i32_0 = arith.constant 0 : i32
    %c0_i32_1 = arith.constant 0 : i32
    return %c0_i32, %c0_i32_0 : i32, i32
  }
  func.func @transform_12(%arg0: i32) -> (i32, i32) {
    %c0_i32 = arith.constant 0 : i32
    %c0_i32_0 = arith.constant 0 : i32
    %c0_i32_1 = arith.constant 0 : i32
    return %c0_i32, %c0_i32_0 : i32, i32
  }
  func.func @transform_13(%arg0: i32) -> (i32, i32) {
    %c0_i32 = arith.constant 0 : i32
    %c0_i32_0 = arith.constant 0 : i32
    %c0_i32_1 = arith.constant 0 : i32
    return %c0_i32, %c0_i32_0 : i32, i32
  }
  func.func @transform_14(%arg0: i32) -> (i32, i32) {
    %c0_i32 = arith.constant 0 : i32
    %c0_i32_0 = arith.constant 0 : i32
    %c0_i32_1 = arith.constant 0 : i32
    return %c0_i32, %c0_i32_0 : i32, i32
  }
  func.func @transform_15(%arg0: i32) -> (i32, i32) {
    %c0_i32 = arith.constant 0 : i32
    %c0_i32_0 = arith.constant 0 : i32
    %c0_i32_1 = arith.constant 0 : i32
    return %c0_i32, %c0_i32_0 : i32, i32
  }
  func.func @transform_16(%arg0: i32) -> i32 {
    %c0_i32 = arith.constant 0 : i32
    %c0_i32_0 = arith.constant 0 : i32
    return %c0_i32 : i32
  }
  func.func @transform_17(%arg0: i32) -> (i32, i32) {
    %c0_i32 = arith.constant 0 : i32
    %c0_i32_0 = arith.constant 0 : i32
    return %arg0, %c0_i32 : i32, i32
  }
  func.func @transform_18(%arg0: i32) -> (i32, i32) {
    %c0_i32 = arith.constant 0 : i32
    %c0_i32_0 = arith.constant 0 : i32
    return %arg0, %c0_i32 : i32, i32
  }
  func.func @transform_19(%arg0: i32) -> (i32, i32) {
    %c0_i32 = arith.constant 0 : i32
    %c0_i32_0 = arith.constant 0 : i32
    return %arg0, %c0_i32 : i32, i32
  }
  func.func @transform_20(%arg0: i32) -> (i32, i32) {
    %c0_i32 = arith.constant 0 : i32
    %c0_i32_0 = arith.constant 0 : i32
    return %arg0, %c0_i32 : i32, i32
  }
}

</mosaic_0001>

<bundles_post_ra>
// kernel: tpu_custom_call.1
= control target key start
LH: loop header
LB: loop body
LE: loop exit
PB: predicated region body
PF: predicated region fallthrough
CT: control target
= control target key end

     0   :  { %s1580_s0 = inlined_call_operand.hbm [shape: f32[8,16], index: 0, kind: input, shape index: {}]   ;;  %s1581_s1 = inlined_call_operand.hbm [shape: f32[8,8], index: 1, kind: input, shape index: {}]   ;;  %s1582_s2 = inlined_call_operand.vmem [shape: f32[8,12], index: 2, kind: input, shape index: {}]   ;;  %s1583_s3 = inlined_call_operand.hbm [shape: bf16[16,128], index: 3, kind: input, shape index: {}]   ;;  %s1584_s4 = inlined_call_operand.hbm [shape: bf16[8,128], index: 4, kind: input, shape index: {}]   ;;  %s1585_s5 = inlined_call_operand.vmem [shape: bf16[12,128], index: 5, kind: input, shape index: {}]   ;;  %s1586_s6 = inlined_call_operand.vmem [shape: f32[1,128], index: 6, kind: input, shape index: {}]   ;;  %s1587_s7 = inlined_call_operand.vmem [shape: f32[1,128], index: 7, kind: input, shape index: {}]   ;;  %s1588_s8 = inlined_call_operand.vmem [shape: f32[1,128], index: 8, kind: input, shape index: {}]   ;;  %s1589_s9 = inlined_call_operand.hbm [shape: bf16[128,256], index: 9, kind: input, shape index: {}]   ;;  %s1590_s10 = inlined_call_operand.hbm [shape: bf16[128,256], index: 10, kind: input, shape index: {}]   ;;  %s1591_s11 = inlined_call_operand.hbm [shape: bf16[128,256], index: 11, kind: input, shape index: {}]   ;;  %s1592_s12 = inlined_call_operand.vmem [shape: f32[1,16], index: 12, kind: input, shape index: {}]   ;;  %s1593_s13 = inlined_call_operand.vmem [shape: f32[1,8], index: 13, kind: input, shape index: {}]   ;;  %s1594_s14 = inlined_call_operand.vmem [shape: f32[1,12], index: 14, kind: input, shape index: {}]   ;;  %s1595_s15 = inlined_call_operand.vmem [shape: f32[2,128], index: 15, kind: input, shape index: {}]   ;;  %s1596_s16 = inlined_call_operand.<no memory space> [shape: f32[1], index: 16, kind: input, shape index: {}]   ;;  %s1597_s17 = inlined_call_operand.hbm [shape: f32[8,16], index: 17, kind: output, shape index: {0}]   ;;  %s1598_s18 = inlined_call_operand.hbm [shape: f32[8,8], index: 18, kind: output, shape index: {1}]   ;;  %s1599_s19 = inlined_call_operand.hbm [shape: f32[8,12], index: 19, kind: output, shape index: {2}]   ;;  %s1600_s20 = inlined_call_operand.vmem [shape: f32[8,1], index: 20, kind: output, shape index: {3}]  }
   0x1   :  { %1609 = sst [smem:[#allocation25_spill]] %s1580_s0 }
   0x2   :  { %1610 = sst [smem:[#allocation26_spill]] %s1581_s1 }
   0x3   :  { %1611 = sst [smem:[#allocation27_spill]] %s1582_s2 }
   0x4   :  { %1612 = sst [smem:[#allocation28_spill]] %s1583_s3 }
   0x5   :  { %1613 = sst [smem:[#allocation29_spill]] %s1584_s4 }
   0x6   :  { %1614 = sst [smem:[#allocation30_spill]] %s1600_s20 }
   0x7   :  { %27 = vsyncpa [#allocation4], 0 }
   0x8   :  { %28 = vsyncpa [#allocation7], 0 }
   0x9   :  { %29 = vsyncpa [#allocation10], 0 }
   0xa   :  { %30 = vsyncpa [#allocation13], 0 }
   0xb   :  { %31 = vsyncpa [#allocation5], 0 }
   0xc   :  { %32 = vsyncpa [#allocation17], 0  ;;  %s1281_s1 = smov [#allocation6]   ;;  %s1282_s23 = smov [#allocation9]  }
   0xd   :  { %s49_s22 = sshll.u32 %s1281_s1, 4  ;;  %s73_s24 = sshll.u32 %s1282_s23, 4  ;;  %s50_s22 = int_to_ptr.vmem [resolvable:$true] %s49_s22  ;;  %s74_s24 = int_to_ptr.vmem [resolvable:$true] %s73_s24 }
   0xe   :  { %s1615_s3 = sld [smem:[#allocation26_spill]] }
  0x14   :  { %s1049_s26 = scalar_lea.hbm %s1615_s3, 128 }
  0x15   :  { %p1050_p0 = scmp.ne.s32.totalorder %s1615_s3, %s1049_s26  ;;  %p1053_p1 = scmp.lt.u32.totalorder %s1049_s26, %s1615_s3 }
  0x17   :  { %p1055_p2 = pnand %p1053_p1, %p1050_p0 }
  0x19   :  { %1058 = shalt.err (!%p1055_p2)
}
  0x1a   :  { %s1059_s30 = scalar_lea.vmem %s50_s22, 128  ;;  %p1064_p4 = scmp.lt.s32.totalorder %s50_s22, %s50_s22 }
  0x1b   :  { %p1060_p3 = scmp.ne.s32.totalorder %s50_s22, %s1059_s30  ;;  %p1065_p5 = scmp.lt.s32.totalorder %s1059_s30, %s1059_s30 }
  0x1d   :  { %p1066_p6 = por %p1065_p5, %p1064_p4 }
  0x1f   :  { %p1067_p7 = pnand %p1066_p6, %p1060_p3 }
  0x21   :  { %1070 = shalt.err (!%p1067_p7)
}
  0x22   :  { %52 = dma.hbm_to_vmem [thread:$0]  %s1615_s3, 128, %s50_s22, [#allocation7]  }
  0x23   :  { %s1616_s2 = sld [smem:[#allocation29_spill]] }
  0x29   :  { %s1071_s25 = scalar_lea.hbm %s1616_s2, 64 }
  0x2a   :  { %p1072_p8 = scmp.ne.s32.totalorder %s1616_s2, %s1071_s25  ;;  %p1075_p9 = scmp.lt.u32.totalorder %s1071_s25, %s1616_s2 }
  0x2c   :  { %p1077_p10 = pnand %p1075_p9, %p1072_p8 }
  0x2e   :  { %1080 = shalt.err (!%p1077_p10)
}
  0x2f   :  { %s1081_s29 = scalar_lea.vmem %s74_s24, 64  ;;  %p1086_p12 = scmp.lt.s32.totalorder %s74_s24, %s74_s24 }
  0x30   :  { %p1082_p11 = scmp.ne.s32.totalorder %s74_s24, %s1081_s29  ;;  %p1087_p13 = scmp.lt.s32.totalorder %s1081_s29, %s1081_s29 }
  0x32   :  { %p1088_p0 = por %p1087_p13, %p1086_p12 }
  0x34   :  { %p1089_p1 = pnand %p1088_p0, %p1082_p11 }
  0x36   :  { %1092 = shalt.err (!%p1089_p1)
}
  0x37   :  { %76 = dma.hbm_to_vmem [thread:$0]  %s1616_s2, 64, %s74_s24, [#allocation10]  }
  0x38   :  { %s1283_s30 = smov [#allocation12]   ;;  %s1284_s21 = smov [#allocation3]  }
  0x39   :  { %s102_s0 = sshll.u32 %s1283_s30, 4  ;;  %s39_s1 = sshll.u32 %s1284_s21, 4  ;;  %s103_s0 = int_to_ptr.vmem [resolvable:$true] %s102_s0  ;;  %s40_s1 = int_to_ptr.vmem [resolvable:$true] %s39_s1 }
  0x3a   :  { %s1093_s27 = scalar_lea.hbm %s1590_s10, 2048 }
  0x3b   :  { %p1094_p2 = scmp.ne.s32.totalorder %s1590_s10, %s1093_s27  ;;  %p1097_p3 = scmp.lt.u32.totalorder %s1093_s27, %s1590_s10 }
  0x3d   :  { %p1099_p4 = pnand %p1097_p3, %p1094_p2 }
  0x3f   :  { %1102 = shalt.err (!%p1099_p4)
}
  0x40   :  { %s1103_s24 = scalar_lea.vmem %s103_s0, 2048  ;;  %p1108_p6 = scmp.lt.s32.totalorder %s103_s0, %s103_s0 }
  0x41   :  { %p1104_p5 = scmp.ne.s32.totalorder %s103_s0, %s1103_s24  ;;  %p1109_p7 = scmp.lt.s32.totalorder %s1103_s24, %s1103_s24 }
  0x43   :  { %p1110_p8 = por %p1109_p7, %p1108_p6 }
  0x45   :  { %p1111_p9 = pnand %p1110_p8, %p1104_p5 }
  0x47   :  { %1114 = shalt.err (!%p1111_p9)
}
  0x48   :  { %s1605_s2 = smov 128   ;;  %s1607_s22 = smov 8  }
  0x49   :  { %108 = dma.hbm_to_vmem [thread:$0]  %s1590_s10, 2048, %s103_s0, [#allocation13], %s1605_s2, %s1605_s2, %s1607_s22  }
  0x4a   :  { %s1617_s25 = sld [smem:[#allocation25_spill]] }
  0x50   :  { %s1115_s27 = scalar_lea.hbm %s1617_s25, 128 }
  0x51   :  { %p1116_p10 = scmp.ne.s32.totalorder %s1617_s25, %s1115_s27  ;;  %p1119_p11 = scmp.lt.u32.totalorder %s1115_s27, %s1617_s25 }
  0x53   :  { %p1121_p12 = pnand %p1119_p11, %p1116_p10 }
  0x55   :  { %1124 = shalt.err (!%p1121_p12)
}
  0x56   :  { %s1125_s24 = scalar_lea.vmem %s40_s1, 128  ;;  %p1130_p0 = scmp.lt.s32.totalorder %s40_s1, %s40_s1 }
  0x57   :  { %p1126_p13 = scmp.ne.s32.totalorder %s40_s1, %s1125_s24  ;;  %p1131_p1 = scmp.lt.s32.totalorder %s1125_s24, %s1125_s24 }
  0x59   :  { %p1132_p2 = por %p1131_p1, %p1130_p0 }
  0x5b   :  { %p1133_p3 = pnand %p1132_p2, %p1126_p13 }
  0x5d   :  { %1136 = shalt.err (!%p1133_p3)
}
  0x5e   :  { %42 = dma.hbm_to_vmem [thread:$0]  %s1617_s25, 128, %s40_s1, [#allocation4]  }
  0x5f   :  { %s1287_s3 = smov [#allocation8]   ;;  %s1618_s28 = sld [smem:[#allocation28_spill]] }
  0x60   :  { %s60_s30 = sshll.u32 %s1287_s3, 4  ;;  %s61_s30 = int_to_ptr.vmem [resolvable:$true] %s60_s30 }
  0x65   :  { %s1137_s27 = scalar_lea.hbm %s1618_s28, 128 }
  0x66   :  { %p1138_p4 = scmp.ne.s32.totalorder %s1618_s28, %s1137_s27  ;;  %p1141_p5 = scmp.lt.u32.totalorder %s1137_s27, %s1618_s28 }
  0x68   :  { %p1143_p6 = pnand %p1141_p5, %p1138_p4 }
  0x6a   :  { %1146 = shalt.err (!%p1143_p6)
}
  0x6b   :  { %s1147_s2 = scalar_lea.vmem %s61_s30, 128  ;;  %p1152_p8 = scmp.lt.s32.totalorder %s61_s30, %s61_s30 }
  0x6c   :  { %p1148_p7 = scmp.ne.s32.totalorder %s61_s30, %s1147_s2  ;;  %p1153_p9 = scmp.lt.s32.totalorder %s1147_s2, %s1147_s2 }
  0x6e   :  { %p1154_p10 = por %p1153_p9, %p1152_p8 }
  0x70   :  { %p1155_p11 = pnand %p1154_p10, %p1148_p7 }
  0x72   :  { %1158 = shalt.err (!%p1155_p11)
}
  0x73   :  { %s1288_s1 = smov 64   ;;  %s1289_s25 = smov 4  }
  0x74   :  { %66 = dma.hbm_to_vmem [thread:$0]  %s1618_s28, 128, %s61_s30, [#allocation7], %s1288_s1, %s1288_s1, %s1289_s25  }
  0x75   :  { %s1290_s3 = smov [#allocation11]   ;;  %s1291_s23 = smov [#allocation14]  }
  0x76   :  { %s90_s21 = sshll.u32 %s1290_s3, 4  ;;  %s114_s27 = sshll.u32 %s1291_s23, 4  ;;  %s91_s21 = int_to_ptr.vmem [resolvable:$true] %s90_s21  ;;  %s115_s27 = int_to_ptr.vmem [resolvable:$true] %s114_s27 }
  0x77   :  { %s1159_s29 = scalar_lea.hbm %s1589_s9, 2048 }
  0x78   :  { %p1160_p12 = scmp.ne.s32.totalorder %s1589_s9, %s1159_s29  ;;  %p1163_p13 = scmp.lt.u32.totalorder %s1159_s29, %s1589_s9 }
  0x7a   :  { %p1165_p0 = pnand %p1163_p13, %p1160_p12 }
  0x7c   :  { %1168 = shalt.err (!%p1165_p0)
}
  0x7d   :  { %s1169_s30 = scalar_lea.vmem %s91_s21, 2048  ;;  %p1174_p2 = scmp.lt.s32.totalorder %s91_s21, %s91_s21 }
  0x7e   :  { %p1170_p1 = scmp.ne.s32.totalorder %s91_s21, %s1169_s30  ;;  %p1175_p3 = scmp.lt.s32.totalorder %s1169_s30, %s1169_s30 }
  0x80   :  { %p1176_p4 = por %p1175_p3, %p1174_p2 }
  0x82   :  { %p1177_p5 = pnand %p1176_p4, %p1170_p1 }
  0x84   :  { %1180 = shalt.err (!%p1177_p5)
}
  0x85   :  { %s1619_s28 = smov 8   ;;  %s1620_s1 = smov 128  }
  0x86   :  { %96 = dma.hbm_to_vmem [thread:$0]  %s1589_s9, 2048, %s91_s21, [#allocation10], %s1620_s1, %s1620_s1, %s1619_s28  }
  0x87   :  { %s1181_s22 = scalar_lea.hbm %s1591_s11, 2048 }
  0x88   :  { %p1182_p6 = scmp.ne.s32.totalorder %s1591_s11, %s1181_s22  ;;  %p1185_p7 = scmp.lt.u32.totalorder %s1181_s22, %s1591_s11 }
  0x8a   :  { %p1187_p8 = pnand %p1185_p7, %p1182_p6 }
  0x8c   :  { %1190 = shalt.err (!%p1187_p8)
}
  0x8d   :  { %s1191_s29 = scalar_lea.vmem %s115_s27, 2048  ;;  %p1196_p10 = scmp.lt.s32.totalorder %s115_s27, %s115_s27 }
  0x8e   :  { %p1192_p9 = scmp.ne.s32.totalorder %s115_s27, %s1191_s29  ;;  %p1197_p11 = scmp.lt.s32.totalorder %s1191_s29, %s1191_s29 }
  0x90   :  { %p1198_p12 = por %p1197_p11, %p1196_p10 }
  0x92   :  { %p1199_p13 = pnand %p1198_p12, %p1192_p9 }
  0x94   :  { %1202 = shalt.err (!%p1199_p13)
}
  0x95   :  { %120 = dma.hbm_to_vmem [thread:$0]  %s1591_s11, 2048, %s115_s27, [#allocation13], %s1620_s1, %s1620_s1, %s1619_s28  }
  0x96   :  { %1269 = dma.done.wait [#allocation4], 128  }
  0x97   :  { %1270 = vsyncadd [#allocation4], 4294967168 }
  0x98   :  { %1271 = dma.done.wait [#allocation7], 256  }
  0x99   :  { %1272 = vsyncadd [#allocation7], 4294967040 }
  0x9a   :  { %1273 = dma.done.wait [#allocation10], 2112  }
  0x9b   :  { %1274 = vsyncadd [#allocation10], 4294965184 }
  0x9c   :  { %1275 = dma.done.wait [#allocation13], 4096  }
  0x9d   :  { %1276 = vsyncadd [#allocation13], 4294963200  ;;  %v1292_v0 = vmov 0.0   ;;  %vm1293_vm0 = vmmov 0   ;;  %v963_v1 = vld [vmem:[#allocation8] sm:$0xff]   ;;  %vm381_vm1 = vcmask 1043456  }
  0x9e   :  { %928 = vmatprep.subr.bf16.mxu0 %v1292_v0  ;;  %930 = vmatprep.mubr.msk.bf16.mxu0 %vm1293_vm0, %v1292_v0  ;;  %v153_v2 = vld [vmem:[#allocation3] sm:$0xff]  ;;  %v369_v3 = vld [vmem:[#allocation9] sm:$0xf]  ;;  %vm170_vm2 = vcmask 130048   ;;  %v367_v8 = vld [vmem:[#allocation6] sm:$0xff]  ;;  %vm377_vm3 = vcmask 64512  }
  0x9f   :  { %929 = vmatpush3.bf16.msra.mxu0 %v963_v1  ;;  %v154_v4 = vpack.c.bf16 %v153_v2, %v153_v2  ;;  %v964_v5 = vld [vmem:[#allocation11 + $0x4] ss:$8 sps:$4 sm:$0xff]   ;;  %v383_v6 = vsel %vm381_vm1, %v369_v3, 0  ;;  %v966_v7 = vld [vmem:[#allocation11] ss:$8 sps:$4 sm:$0xff]   ;;  %v368_v13 = vpack.c.bf16 %v367_v8, %v367_v8  ;;  %v1294_v37 = vmov 0  }
  0xa0   :  { %934 = vmatprep.subr.bf16.mxu0 %v1292_v0  ;;  %312 = vmatprep.subr.bf16.mxu1 %v964_v5  ;;  %v967_v9 = vld [vmem:[#allocation11 + $0x14] ss:$8 sps:$4 sm:$0xff]   ;;  %v969_v10 = vld [vmem:[#allocation11 + $0x10] ss:$8 sps:$4 sm:$0xff]   ;;  %v970_v11 = vld [vmem:[#allocation11 + $0x24] ss:$8 sps:$4 sm:$0xff]  }
  0xa1   :  { %313 = vmatpush1.bf16.msra.mxu1 %v966_v7  ;;  %v974_v12 = vld [vmem:[#allocation12 + $0x4] ss:$8 sps:$4 sm:$0xff]   ;;  %v972_v14 = vld [vmem:[#allocation12] ss:$8 sps:$4 sm:$0xff]   ;;  %v976_v16 = vld [vmem:[#allocation11 + $0x34] ss:$8 sps:$4 sm:$0xff]   ;;  %344 = vmatprep.mubr.bf16.mxu1 %v1294_v37 }
  0xa2   :  { %931 = vmatmul.mubr.msk.bf16.vlgmr.msra.gmra.mrb[0].mxu0 %vm170_vm2, %v154_v4  ;;  %314 = vmatprep.subr.bf16.mxu1 %v967_v9  ;;  %v975_v15 = vld [vmem:[#allocation11 + $0x20] ss:$8 sps:$4 sm:$0xff]   ;;  %v980_v17 = vld [vmem:[#allocation12 + $0x14] ss:$8 sps:$4 sm:$0xff]   ;;  %v981_v18 = vld [vmem:[#allocation11 + $0x30] ss:$8 sps:$4 sm:$0xff]  }
  0xa3   :  { %935 = vmatpush3.bf16.msra.mxu0 %v383_v6  ;;  %936 = vmatprep.mubr.msk.bf16.mxu0 %vm1293_vm0, %v1292_v0  ;;  %v978_v19 = vld [vmem:[#allocation12 + $0x10] ss:$8 sps:$4 sm:$0xff]   ;;  %v982_v20 = vld [vmem:[#allocation11 + $0x44] ss:$8 sps:$4 sm:$0xff]   ;;  %v984_v22 = vld [vmem:[#allocation12 + $0x20] ss:$8 sps:$4 sm:$0xff]  }
  0xa4   :  { %523 = vmatprep.subr.bf16.mxu0 %v974_v12  ;;  %v986_v21 = vld [vmem:[#allocation12 + $0x24] ss:$8 sps:$4 sm:$0xff]   ;;  %v987_v23 = vld [vmem:[#allocation11 + $0x40] ss:$8 sps:$4 sm:$0xff]   ;;  %v988_v24 = vld [vmem:[#allocation11 + $0x54] ss:$8 sps:$4 sm:$0xff]  }
  0xa5   :  { %315 = vmatpush1.bf16.msra.mxu1 %v969_v10  ;;  %v992_v25 = vld [vmem:[#allocation12 + $0x34] ss:$8 sps:$4 sm:$0xff]   ;;  %v990_v26 = vld [vmem:[#allocation12 + $0x30] ss:$8 sps:$4 sm:$0xff]   ;;  %v994_v28 = vld [vmem:[#allocation11 + $0x64] ss:$8 sps:$4 sm:$0xff]  }
  0xa6   :  { %316 = vmatprep.subr.bf16.mxu1 %v970_v11  ;;  %v993_v27 = vld [vmem:[#allocation11 + $0x50] ss:$8 sps:$4 sm:$0xff]   ;;  %v998_v29 = vld [vmem:[#allocation12 + $0x44] ss:$8 sps:$4 sm:$0xff]   ;;  %v996_v30 = vld [vmem:[#allocation12 + $0x40] ss:$8 sps:$4 sm:$0xff]  }
  0xa7   :  { %v999_v31 = vld [vmem:[#allocation11 + $0x60] ss:$8 sps:$4 sm:$0xff]   ;;  %v1000_v32 = vld [vmem:[#allocation11 + $0x74] ss:$8 sps:$4 sm:$0xff]   ;;  %v1002_v34 = vld [vmem:[#allocation12 + $0x50] ss:$8 sps:$4 sm:$0xff]  }
  0xa8   :  { %v1004_v33 = vld [vmem:[#allocation12 + $0x54] ss:$8 sps:$4 sm:$0xff]   ;;  %v1005_v35 = vld [vmem:[#allocation11 + $0x70] ss:$8 sps:$4 sm:$0xff]   ;;  %v1008_v36 = vld [vmem:[#allocation12 + $0x64] ss:$8 sps:$4 sm:$0xff]  }
  0xa9   :  { %317 = vmatpush1.bf16.msra.mxu1 %v975_v15  ;;  %v1006_v38 = vld [vmem:[#allocation12 + $0x60] ss:$8 sps:$4 sm:$0xff]   ;;  %v1011_v39 = vld [vmem:[#allocation12 + $0x74] ss:$8 sps:$4 sm:$0xff]   ;;  %v1009_v40 = vld [vmem:[#allocation12 + $0x70] ss:$8 sps:$4 sm:$0xff]  }
  0xaa   :  { %937 = vmatmul.mubr.msk.bf16.vlgmr.msra.gmra.mrb[4].mxu0 %vm377_vm3, %v368_v13  ;;  %318 = vmatprep.subr.bf16.mxu1 %v976_v16  ;;  %v863_v41 = vld [vmem:[%s1586_s6] ss:$0 sm:$0xff]  ;;  %vm598_vm4 = vcmask 1045504   ;;  %s1621_s1 = sld [smem:[#allocation27_spill]]  ;;  %vm594_vm5 = vcmask 97280   ;;  %s1296_s23 = smov [#allocation15]  }
  0xab   :  { %524 = vmatpush1.bf16.msra.mxu0 %v972_v14  ;;  %555 = vmatprep.mubr.bf16.mxu0 %v1294_v37  ;;  %v883_v47 = vld [vmem:[%s1587_s7] ss:$0 sm:$0xff]  ;;  %v1013_v62 = vld [vmem:[#allocation14] ss:$8 sps:$4 sm:$0xff]   ;;  %v1018_v63 = vld [vmem:[#allocation14 + $0x14] ss:$8 sps:$4 sm:$0xff]  }
  0xac   :  { %525 = vmatprep.subr.bf16.mxu0 %v980_v17  ;;  %v1012_v55 = vld [vmem:[%s1585_s5] sm:$0x3f]   ;;  %v1016_v1 = vld [vmem:[#allocation14 + $0x10] ss:$8 sps:$4 sm:$0xff]   ;;  %v1030_v7 = vld [vmem:[#allocation14 + $0x54] ss:$8 sps:$4 sm:$0xff]  }
  0xad   :  { %319 = vmatpush1.bf16.msra.mxu1 %v981_v18  ;;  %v600_v58 = vsel %vm598_vm4, %v1012_v55, 0  ;;  %v1015_v61 = vld [vmem:[#allocation14 + $0x4] ss:$8 sps:$4 sm:$0xff]   ;;  %v1019_v3 = vld [vmem:[#allocation14 + $0x20] ss:$8 sps:$4 sm:$0xff]   ;;  %s820_s26 = sshll.u32 %s1296_s23, 4  ;;  %s821_s26 = int_to_ptr.vmem [resolvable:$true] %s820_s26 }
  0xae   :  { %320 = vmatprep.subr.bf16.mxu1 %v982_v20  ;;  %v1021_v2 = vld [vmem:[#allocation14 + $0x24] ss:$8 sps:$4 sm:$0xff]   ;;  %v1022_v4 = vld [vmem:[#allocation14 + $0x30] ss:$8 sps:$4 sm:$0xff]   ;;  %v1025_v6 = vld [vmem:[#allocation14 + $0x40] ss:$8 sps:$4 sm:$0xff]  }
  0xaf   :  { %526 = vmatpush1.bf16.msra.mxu0 %v978_v19  ;;  %v1027_v5 = vld [vmem:[#allocation14 + $0x44] ss:$8 sps:$4 sm:$0xff]   ;;  %v1028_v8 = vld [vmem:[#allocation14 + $0x50] ss:$8 sps:$4 sm:$0xff]   ;;  %v1031_v10 = vld [vmem:[#allocation14 + $0x60] ss:$8 sps:$4 sm:$0xff]  }
  0xb0   :  { %527 = vmatprep.subr.bf16.mxu0 %v986_v21  ;;  %v578_v59 = vld [vmem:[%s1621_s1] sm:$0xff]  ;;  %v1036_v11 = vld [vmem:[#allocation14 + $0x74] ss:$8 sps:$4 sm:$0xff]   ;;  %v1034_v12 = vld [vmem:[#allocation14 + $0x70] ss:$8 sps:$4 sm:$0xff]  }
  0xb1   :  { %321 = vmatpush1.bf16.msra.mxu1 %v987_v23  ;;  %v579_v60 = vpack.c.bf16 %v578_v59, %v578_v59  ;;  %v1033_v9 = vld [vmem:[#allocation14 + $0x64] ss:$8 sps:$4 sm:$0xff]  }
  0xb2   :  { %322 = vmatprep.subr.bf16.mxu1 %v988_v24  ;;  %v882_v13 = vld [vmem:[%s1592_s12] ss:$0 sm:$0xff] }
  0xb3   :  { %528 = vmatpush1.bf16.msra.mxu0 %v984_v22  ;;  %v901_v20 = vld [vmem:[%s1593_s13] ss:$0 sm:$0xff] }
  0xb4   :  { %529 = vmatprep.subr.bf16.mxu0 %v992_v25 }
  0xb5   :  { %323 = vmatpush1.bf16.msra.mxu1 %v993_v27 }
  0xb6   :  { %324 = vmatprep.subr.bf16.mxu1 %v994_v28  ;;  %v902_v28 = vld [vmem:[%s1588_s8] ss:$0 sm:$0xff] }
  0xb7   :  { %530 = vmatpush1.bf16.msra.mxu0 %v990_v26 }
  0xb8   :  { %531 = vmatprep.subr.bf16.mxu0 %v998_v29 }
  0xb9   :  { %325 = vmatpush1.bf16.msra.mxu1 %v999_v31 }
  0xba   :  { %326 = vmatprep.subr.bf16.mxu1 %v1000_v32 }
  0xbb   :  { %532 = vmatpush1.bf16.msra.mxu0 %v996_v30 }
  0xbc   :  { %533 = vmatprep.subr.bf16.mxu0 %v1004_v33 }
  0xbd   :  { %327 = vmatpush1.bf16.msra.mxu1 %v1005_v35 }
  0xbe   :  { %740 = vmatprep.subr.bf16.mxu1 %v1015_v61 }
  0xbf   :  { %534 = vmatpush1.bf16.msra.mxu0 %v1002_v34 }
  0xc0   :  { %535 = vmatprep.subr.bf16.mxu0 %v1008_v36 }
  0xc3   :  { %536 = vmatpush1.bf16.msra.mxu0 %v1006_v38 }
  0xc4   :  { %537 = vmatprep.subr.bf16.mxu0 %v1011_v39 }
  0xc7   :  { %538 = vmatpush1.bf16.msra.mxu0 %v1009_v40 }
  0xc8   :  { %940 = vmatprep.subr.bf16.mxu0 %v1292_v0 }
 0x175   :  { %v208_v42 = vpop.f32.mrb[0].mxu0 }
 0x176   :  { %v209_v43 = vadd.f32 %v863_v41, %v208_v42  ;;  %v932_v44 = vpop.f32.mrb[1].mxu0  ;;  %v796_v42 = vlaneseq }
 0x177   :  { %v211_v45 = vpop.f32.mrb[2].mxu0 }
 0x178   :  { %1037 = vtanh.f32 %v209_v43  ;;  %v933_v46 = vpop.f32.mrb[3].mxu0  ;;  %v797_v43 = vshrl.u32 %v796_v42, 7  ;;  %v795_v45 = vld [vmem:[%s1595_s15] sm:$0x3] }
 0x179   :  { %v921_v46 = vld [vmem:[%s1594_s14] ss:$0 sm:$0xff]  ;;  %s1295_s14 = smov [#allocation16]  }
 0x17a   :  { %v798_v44 = vsub.s32 0, %v797_v43  ;;  %s830_s15 = sshll.u32 %s1295_s14, 4  ;;  %s831_s15 = int_to_ptr.vmem [resolvable:$true] %s830_s15 }
 0x17b   :  { %s1203_s4 = scalar_lea.vmem %s831_s15, 128  ;;  %p1208_p1 = scmp.lt.s32.totalorder %s831_s15, %s831_s15 }
 0x17c   :  { %p1204_p0 = scmp.ne.s32.totalorder %s831_s15, %s1203_s4  ;;  %p1209_p2 = scmp.lt.s32.totalorder %s1203_s4, %s1203_s4 }
 0x17d   :  { %v419_v48 = vpop.f32.mrb[4].mxu0 }
 0x17e   :  { %v420_v49 = vadd.f32 %v883_v47, %v419_v48  ;;  %v938_v50 = vpop.f32.mrb[5].mxu0  ;;  %v799_v48 = vrot.slane %v795_v45, %v798_v44  ;;  %p1210_p3 = por %p1209_p2, %p1208_p1 }
 0x17f   :  { %v422_v51 = vpop.f32.mrb[6].mxu0 }
 0x180   :  { %1039 = vtanh.f32 %v420_v49  ;;  %v939_v52 = vpop.f32.mrb[7].mxu0  ;;  %v804_v49 = vsub.s32 1, %v797_v43  ;;  %p1211_p4 = pnand %p1210_p3, %p1204_p0 }
 0x182   :  { %v1038_v53 = vpop.eup %1037 }
 0x183   :  { %v215_v54 = vpack.c.bf16 %v1038_v53, %v1038_v53 }
 0x185   :  { %345 = vmatmul.mubr.bf16.vlgmr.msra.gmra.mrb[0].mxu1 %v215_v54 }
 0x186   :  { %772 = vmatprep.mubr.bf16.mxu1 %v1294_v37  ;;  %741 = vmatpush1.bf16.msra.mxu1 %v1013_v62 }
 0x187   :  { %742 = vmatprep.subr.bf16.mxu1 %v1018_v63 }
 0x18a   :  { %v1040_v56 = vpop.eup %1039  ;;  %743 = vmatpush1.bf16.msra.mxu1 %v1016_v1 }
 0x18b   :  { %v426_v57 = vpack.c.bf16 %v1040_v56, %v1040_v56  ;;  %744 = vmatprep.subr.bf16.mxu1 %v1021_v2 }
 0x18d   :  { %556 = vmatmul.mubr.bf16.vlgmr.msra.gmra.mrb[8].mxu0 %v426_v57  ;;  %v805_v57 = vrot.slane %v795_v45, %v804_v49 }
 0x18e   :  { %941 = vmatpush3.bf16.msra.mxu0 %v600_v58  ;;  %942 = vmatprep.mubr.msk.bf16.mxu0 %vm1293_vm0, %v1292_v0  ;;  %v1024_v0 = vld [vmem:[#allocation14 + $0x34] ss:$8 sps:$4 sm:$0xff]  }
 0x18f   :  { %745 = vmatpush1.bf16.msra.mxu1 %v1019_v3 }
 0x190   :  { %746 = vmatprep.subr.bf16.mxu1 %v1024_v0 }
 0x193   :  { %747 = vmatpush1.bf16.msra.mxu1 %v1022_v4 }
 0x194   :  { %748 = vmatprep.subr.bf16.mxu1 %v1027_v5 }
 0x195   :  { %943 = vmatmul.mubr.msk.bf16.vlgmr.msra.gmra.mrb[12].mxu0 %vm594_vm5, %v579_v60 }
 0x197   :  { %749 = vmatpush1.bf16.msra.mxu1 %v1025_v6 }
 0x198   :  { %750 = vmatprep.subr.bf16.mxu1 %v1030_v7 }
 0x19b   :  { %751 = vmatpush1.bf16.msra.mxu1 %v1028_v8 }
 0x19c   :  { %752 = vmatprep.subr.bf16.mxu1 %v1033_v9 }
 0x19f   :  { %753 = vmatpush1.bf16.msra.mxu1 %v1031_v10 }
 0x1a0   :  { %754 = vmatprep.subr.bf16.mxu1 %v1036_v11 }
 0x1a3   :  { %755 = vmatpush1.bf16.msra.mxu1 %v1034_v12 }
 0x258   :  { %v346_v14 = vpop.f32.mrb[0].mxu1 }
 0x259   :  { %v360_v15 = vadd.f32 %v882_v13, %v346_v14  ;;  %v348_v16 = vpop.f32.mrb[1].mxu1 }
 0x25a   :  { %v350_v17 = vpop.f32.mrb[2].mxu1 }
 0x25b   :  { %v361_v18 = vmul.f32 0.5, %v360_v15  ;;  %v351_v19 = vpop.f32.mrb[3].mxu1 }
 0x25d   :  { %1041 = vtanh.f32 %v361_v18 }
 0x260   :  { %v557_v21 = vpop.f32.mrb[8].mxu0 }
 0x261   :  { %v571_v22 = vadd.f32 %v901_v20, %v557_v21  ;;  %v559_v23 = vpop.f32.mrb[9].mxu0 }
 0x262   :  { %v577_v24 = vadd.f32 %v559_v23, %v348_v16  ;;  %v561_v25 = vpop.f32.mrb[10].mxu0 }
 0x263   :  { %v572_v26 = vmul.f32 0.5, %v571_v22  ;;  %v562_v27 = vpop.f32.mrb[11].mxu0 }
 0x265   :  { %1043 = vtanh.f32 %v572_v26 }
 0x267   :  { %v1042_v29 = vpop.eup %1041 }
 0x268   :  { %v363_v30 = vadd.f32 1.0, %v1042_v29  ;;  %v636_v31 = vpop.f32.mrb[12].mxu0 }
 0x269   :  { %v637_v32 = vadd.f32 %v902_v28, %v636_v31  ;;  %v944_v33 = vpop.f32.mrb[13].mxu0 }
 0x26a   :  { %v364_v34 = vmul.f32 0.5, %v363_v30  ;;  %v639_v35 = vpop.f32.mrb[14].mxu0 }
 0x26b   :  { %1045 = vtanh.f32 %v637_v32  ;;  %v945_v36 = vpop.f32.mrb[15].mxu0 }
 0x26c   :  { %365 = vst.msk [vmem:[#allocation15] sm:$0xff] %vm170_vm2, %v364_v34 }
 0x26f   :  { %v1044_v37 = vpop.eup %1043 }
 0x270   :  { %v574_v38 = vadd.f32 1.0, %v1044_v37 }
 0x272   :  { %v575_v39 = vmul.f32 0.5, %v574_v38 }
 0x274   :  { %576 = vst.msk [vmem:[#allocation16] sm:$0xff] %vm377_vm3, %v575_v39 }
 0x275   :  { %v1046_v40 = vpop.eup %1045 }
 0x276   :  { %v643_v41 = vpack.c.bf16 %v1046_v40, %v1046_v40 }
 0x278   :  { %773 = vmatmul.mubr.bf16.vlgmr.msra.gmra.mrb[4].mxu1 %v643_v41 }
 0x34b   :  { %v774_v47 = vpop.f32.mrb[4].mxu1 }
 0x34c   :  { %v788_v50 = vadd.f32 %v921_v46, %v774_v47  ;;  %v776_v51 = vpop.f32.mrb[5].mxu1 }
 0x34d   :  { %v794_v52 = vadd.f32 %v776_v51, %v577_v24  ;;  %v778_v53 = vpop.f32.mrb[6].mxu1 }
 0x34e   :  { %v789_v54 = vmul.f32 0.5, %v788_v50  ;;  %v779_v55 = vpop.f32.mrb[7].mxu1 }
 0x34f   :  { %v800_v56 = vadd.f32 %v799_v48, %v794_v52 }
 0x350   :  { %1047 = vtanh.f32 %v789_v54 }
 0x351   :  { %v801_v58 = vmax.f32 %v800_v56, 0.0 }
 0x353   :  { %v806_v59 = vmul.f32 %v805_v57, %v801_v58 }
 0x355   :  { %807 = vadd.xlane.f32.xlu0 %v806_v59 }
 0x35a   :  { %v1048_v60 = vpop.eup %1047 }
 0x35b   :  { %v791_v61 = vadd.f32 1.0, %v1048_v60 }
 0x35d   :  { %v792_v62 = vmul.f32 0.5, %v791_v61 }
 0x35f   :  { %793 = vst.msk [vmem:[#allocation18] sm:$0xff] %vm594_vm5, %v792_v62 }
 0x360   :  { %1214 = shalt.err (!%p1211_p4)
}
 0x361   :  { %s1215_s21 = scalar_lea.hbm %s1598_s18, 128 }
 0x362   :  { %p1216_p5 = scmp.ne.s32.totalorder %s1598_s18, %s1215_s21  ;;  %p1219_p6 = scmp.lt.u32.totalorder %s1215_s21, %s1598_s18 }
 0x364   :  { %p1221_p7 = pnand %p1219_p6, %p1216_p5 }
 0x366   :  { %1224 = shalt.err (!%p1221_p7)
}
 0x367   :  { %833 = dma.vmem_to_hbm [thread:$0]  %s831_s15, 128, %s1598_s18, [#allocation17]  }
 0x368   :  { %s1225_s7 = scalar_lea.vmem %s821_s26, 128  ;;  %p1230_p9 = scmp.lt.s32.totalorder %s821_s26, %s821_s26 }
 0x369   :  { %p1226_p8 = scmp.ne.s32.totalorder %s821_s26, %s1225_s7  ;;  %p1231_p10 = scmp.lt.s32.totalorder %s1225_s7, %s1225_s7 }
 0x36b   :  { %p1232_p11 = por %p1231_p10, %p1230_p9 }
 0x36d   :  { %p1233_p12 = pnand %p1232_p11, %p1226_p8 }
 0x36f   :  { %1236 = shalt.err (!%p1233_p12)
}
 0x370   :  { %s1237_s5 = scalar_lea.hbm %s1597_s17, 128 }
 0x371   :  { %p1238_p13 = scmp.ne.s32.totalorder %s1597_s17, %s1237_s5  ;;  %p1241_p0 = scmp.lt.u32.totalorder %s1237_s5, %s1597_s17 }
 0x373   :  { %p1243_p1 = pnand %p1241_p0, %p1238_p13 }
 0x375   :  { %1246 = shalt.err (!%p1243_p1)
}
 0x376   :  { %823 = dma.vmem_to_hbm [thread:$0]  %s821_s26, 128, %s1597_s17, [#allocation5]  }
 0x377   :  { %s1297_s8 = smov [#allocation18]  }
 0x378   :  { %s840_s13 = sshll.u32 %s1297_s8, 4  ;;  %s841_s13 = int_to_ptr.vmem [resolvable:$true] %s840_s13 }
 0x379   :  { %s1247_s22 = scalar_lea.vmem %s841_s13, 128  ;;  %p1252_p3 = scmp.lt.s32.totalorder %s841_s13, %s841_s13 }
 0x37a   :  { %p1248_p2 = scmp.ne.s32.totalorder %s841_s13, %s1247_s22  ;;  %p1253_p4 = scmp.lt.s32.totalorder %s1247_s22, %s1247_s22 }
 0x37c   :  { %p1254_p5 = por %p1253_p4, %p1252_p3 }
 0x37e   :  { %p1255_p6 = pnand %p1254_p5, %p1248_p2 }
 0x380   :  { %1258 = shalt.err (!%p1255_p6)
}
 0x381   :  { %s1259_s15 = scalar_lea.hbm %s1599_s19, 128 }
 0x382   :  { %p1260_p7 = scmp.ne.s32.totalorder %s1599_s19, %s1259_s15  ;;  %p1263_p8 = scmp.lt.u32.totalorder %s1259_s15, %s1599_s19 }
 0x384   :  { %p1265_p9 = pnand %p1263_p8, %p1260_p7 }
 0x386   :  { %1268 = shalt.err (!%p1265_p9)
}
 0x387   :  { %843 = dma.vmem_to_hbm [thread:$0]  %s841_s13, 128, %s1599_s19, [#allocation17]   ;;  %v810_v63 = vstv %s1596_s16  ;;  %vm812_vm6 = vcmask 7168  }
 0x388   :  { %s1622_s2 = sld [smem:[#allocation30_spill]] }
 0x3e2   :  { %v808_v1 = vpop.xlane.xlu0 %807 }
 0x3e3   :  { %v811_v2 = vadd.f32 %v810_v63, %v808_v1 }
 0x3e5   :  { %813 = vst.msk [vmem:[%s1622_s2] sm:$0xff] %vm812_vm6, %v811_v2 }
 0x3e6   :  { %1277 = dma.done.wait [#allocation5], 128  }
 0x3e7   :  { %1278 = vsyncadd [#allocation5], 4294967168 }
 0x3e8   :  { %1279 = dma.done.wait [#allocation17], 256  }
 0x3e9   :  { %1280 = vsyncadd [#allocation17], 4294967040 }
 0x3ea   :  { %857 = vsyncpa [#allocation4], 1 }
 0x3eb   :  { %858 = vsyncpa [#allocation7], 1 }
 0x3ec   :  { %859 = vsyncpa [#allocation10], 1 }
 0x3ed   :  { %860 = vsyncpa [#allocation13], 1 }
 0x3ee   :  { %861 = vsyncpa [#allocation5], 1 }
 0x3ef   :  { %862 = vsyncpa [#allocation17], 1 }

</bundles_post_ra>
